<compile_context>
chip_gen: v7x
topology: tpu7x:2x2x1
jax: 0.10.0
libtpu: 0.0.40
codegen_flags: <defaults>
</compile_context>

<pallas_src>
import jax
import jax.numpy as jnp
from jax.experimental import pallas as pl
from jax.experimental.pallas import tpu as pltpu


# ---------------------------------------------------------------------------
# Kernels
# ---------------------------------------------------------------------------

def _mlp(pooled_f32, w1_ref, b1_ref, w2_ref, b2_ref):
    """Linear -> ReLU -> Linear on an f32 [TB, D] block (weights stay resident)."""
    hid = jnp.dot(pooled_f32, w1_ref[...], preferred_element_type=jnp.float32)
    hid = jnp.maximum(hid + b1_ref[...].astype(jnp.float32), 0.0)          # [TB, H]
    z = jnp.dot(hid, w2_ref[...], preferred_element_type=jnp.float32)
    return z + b2_ref[...].astype(jnp.float32)                             # [TB, O]


def _projector_avg_kernel(h_ref, m_ref, invlen_ref, w1_ref, b1_ref, w2_ref, b2_ref,
                          out_ref, acc_ref):
    """Masked sum over S tiles (f32 accumulator) + scale by 1/len + MLP epilogue."""
    s = pl.program_id(1)

    @pl.when(s == 0)
    def _init():
        acc_ref[...] = jnp.zeros_like(acc_ref)

    # Masked partial sum of this S tile with f32 accumulation:
    #   acc[b, 0, d] += sum_s m[b, 0, s] * h[b, s, d]
    # Mask is already in h's dtype (cast once in the wrapper); the accumulator
    # matches the contraction's [TB, 1, D] output so there is no per-step
    # squeeze/relayout.
    # TODO(synk): A/B-benchmark a VPU pooling variant (mask relayout + multiply
    # + sublane reduce) — with M=1 per batch row this MXU contraction may not
    # fully hide under the HBM stream, especially on v5e.
    acc_ref[...] += jnp.einsum("bqs,bsd->bqd", m_ref[...], h_ref[...],
                               preferred_element_type=jnp.float32)

    @pl.when(s == pl.num_programs(1) - 1)
    def _finalize():
        pooled = acc_ref[...][:, 0, :] * invlen_ref[...]                   # [TB, D] f32
        out_ref[...] = _mlp(pooled, w1_ref, b1_ref, w2_ref, b2_ref).astype(out_ref.dtype)


def _projector_cls_kernel(x_ref, w1_ref, b1_ref, w2_ref, b2_ref, out_ref):
    """do_avg=False path: MLP on the pre-sliced token-0 block [TB, D]."""
    out_ref[...] = _mlp(x_ref[...].astype(jnp.float32),
                        w1_ref, b1_ref, w2_ref, b2_ref).astype(out_ref.dtype)


# ---------------------------------------------------------------------------
# Tiling / budgeting helpers
# ---------------------------------------------------------------------------

def _round_up(x: int, m: int) -> int:
    return ((x + m - 1) // m) * m


def _vmem_capacity_bytes() -> int:
    """Per-chip VMEM capacity; conservative 64 MiB (v7x) if the query fails."""
    try:
        cap = getattr(pltpu.get_tpu_info(), "vmem_capacity_bytes", None)
        if cap:
            return int(cap)
    except Exception:
        pass
    return 64 << 20


def _batch_tiling(B: int):
    """Return (TB, padded_B).  >=2 batch tiles whenever B >= 16 so the
    'parallel' grid axis can shard across both TensorCores on v7x."""
    if B < 16:
        return B, B                      # single tile; TB == B is always legal
    Bp = _round_up(B, 8)
    TB = 8
    t = 16
    while t <= min(128, Bp // 2):
        if Bp % t == 0:
            TB = t
        t += 8
    return TB, Bp


# ---------------------------------------------------------------------------
# Wrapper
# ---------------------------------------------------------------------------

def projector_forward(last_hidden, mask, w1, b1, w2, b2, *, do_avg=True):
    """Pallas equivalent of Projector.forward.

    last_hidden: [B, S, D];  mask: [B, S] (0/1, only used when do_avg=True)
    w1: [D, H], b1: [1, H], w2: [H, O], b2: [1, O]
    returns z: [B, O] in last_hidden.dtype
    """
    B, S, D = last_hidden.shape
    H = w1.shape[1]
    O = w2.shape[1]
    out_dtype = last_hidden.dtype
    out_isz = jnp.dtype(out_dtype).itemsize
    h_isz = last_hidden.dtype.itemsize

    w_bytes = (w1.size * w1.dtype.itemsize + b1.size * b1.dtype.itemsize +
               w2.size * w2.dtype.itemsize + b2.size * b2.dtype.itemsize)

    # --- generation-aware VMEM budgets -------------------------------------
    vmem_cap = _vmem_capacity_bytes()
    if vmem_cap >= (96 << 20):                 # v5e / v6e: 128 MiB VMEM
        stream_budget, limit_cap = 40 << 20, 100 << 20
    else:                                      # v7x: 64 MiB VMEM
        stream_budget, limit_cap = 10 << 20, 52 << 20

    def _limit(need):
        lim = min(max(need + need // 4 + (1 << 20), 16 << 20), limit_cap)
        if lim < need + (1 << 20):             # never request less than we need
            lim = min(need + (1 << 20), (vmem_cap * 9) // 10)
        return int(lim)

    TB, Bp = _batch_tiling(B)

    # ---------------- do_avg=False: CLS token only -------------------------
    if not do_avg:
        # Only token 0 is needed: slice it in the wrapper so the kernel never
        # DMAs the full [B, S, D] tensor.
        cls = last_hidden[:, 0, :]                                   # [B, D]
        if Bp != B:
            cls = jnp.pad(cls, ((0, Bp - B), (0, 0)))
        need = (2 * TB * D * h_isz + 2 * w_bytes
                + 2 * TB * max(O, 128) * out_isz + (1 << 20))
        grid_spec = pltpu.PrefetchScalarGridSpec(
            num_scalar_prefetch=0,
            grid=(Bp // TB,),
            in_specs=[
                pl.BlockSpec((TB, D), lambda i: (i, 0)),
                pl.BlockSpec((D, H), lambda i: (0, 0)),      # resident weights
                pl.BlockSpec((1, H), lambda i: (0, 0)),
                pl.BlockSpec((H, O), lambda i: (0, 0)),
                pl.BlockSpec((1, O), lambda i: (0, 0)),
            ],
            out_specs=pl.BlockSpec((TB, O), lambda i: (i, 0)),
        )
        out = pl.pallas_call(
            _projector_cls_kernel,
            out_shape=jax.ShapeDtypeStruct((Bp, O), out_dtype),
            grid_spec=grid_spec,
            compiler_params=pltpu.CompilerParams(
                dimension_semantics=("parallel",),
                vmem_limit_bytes=_limit(need)),
        )(cls, w1, b1, w2, b2)
        return out[:B] if Bp != B else out

    # ---------------- do_avg=True: masked mean pool + MLP -------------------
    # Sequence tiling: TS is either the full S (no pad, one reduction step) or
    # a 128-aligned divisor of the 128-padded S whose double-buffered
    # [TB, TS, D] (+ mask) tiles fit the per-chip streaming budget.
    def _stream_bytes(tb, ts):
        # hidden tiles + mask tiles (mask block (tb, 1, ts) pads sublanes 1->8)
        return 2 * tb * ts * D * h_isz + 2 * tb * 8 * ts * h_isz

    if S <= 128 or _stream_bytes(TB, S) <= stream_budget:
        TS, Sp = S, S
    else:
        Sp = _round_up(S, 128)
        TS = 128
        t = 256
        while t <= Sp:
            if Sp % t == 0 and _stream_bytes(TB, t) <= stream_budget:
                TS = t
            t += 128
    if _stream_bytes(TB, TS) > stream_budget and TB > 8 and Bp % 8 == 0:
        TB = 8                                  # last resort: shrink batch tile

    # Precompute 1/sentence_length in the wrapper (f32): no per-tile mask sum,
    # no in-kernel reciprocal.  All-zero mask rows keep the PyTorch NaN/Inf
    # semantics; padded batch rows get inv_len = 0 (finite) and are sliced off.
    seq_len = jnp.sum(mask.astype(jnp.float32), axis=1, keepdims=True)  # [B, 1]
    inv_len = 1.0 / seq_len

    h = last_hidden
    m = mask.astype(last_hidden.dtype)          # cast once, not per tile
    if Sp != S:
        h = jnp.pad(h, ((0, 0), (0, Sp - S), (0, 0)))
        m = jnp.pad(m, ((0, 0), (0, Sp - S)))
    if Bp != B:
        h = jnp.pad(h, ((0, Bp - B), (0, 0), (0, 0)))
        m = jnp.pad(m, ((0, Bp - B), (0, 0)))
        inv_len = jnp.pad(inv_len, ((0, Bp - B), (0, 0)))
    m3 = m[:, None, :]                          # [Bp, 1, Sp]

    acc_bytes = TB * 8 * D * 4                  # (TB, 1, D) f32 scratch, sublane-padded
    need = (_stream_bytes(TB, TS) + 2 * w_bytes + acc_bytes
            + 2 * TB * 128 * 4                  # inv_len blocks (lane-padded)
            + 2 * TB * max(O, 128) * out_isz    # output blocks
            + (1 << 20))

    grid_spec = pltpu.PrefetchScalarGridSpec(
        num_scalar_prefetch=0,
        grid=(Bp // TB, Sp // TS),
        in_specs=[
            pl.BlockSpec((TB, TS, D), lambda i, s: (i, s, 0)),   # hidden tile
            pl.BlockSpec((TB, 1, TS), lambda i, s: (i, 0, s)),   # mask tile [B,1,S]
            pl.BlockSpec((TB, 1),     lambda i, s: (i, 0)),      # 1 / sentence_length
            pl.BlockSpec((D, H), lambda i, s: (0, 0)),           # resident W1
            pl.BlockSpec((1, H), lambda i, s: (0, 0)),           # resident b1
            pl.BlockSpec((H, O), lambda i, s: (0, 0)),           # resident W2
            pl.BlockSpec((1, O), lambda i, s: (0, 0)),           # resident b2
        ],
        out_specs=pl.BlockSpec((TB, O), lambda i, s: (i, 0)),    # lane-dense, full O
        scratch_shapes=[pltpu.VMEM((TB, 1, D), jnp.float32)],    # pooled accumulator
    )
    out = pl.pallas_call(
        _projector_avg_kernel,
        out_shape=jax.ShapeDtypeStruct((Bp, O), out_dtype),
        grid_spec=grid_spec,
        compiler_params=pltpu.CompilerParams(
            dimension_semantics=("parallel", "arbitrary"),       # B parallel, S reduce
            vmem_limit_bytes=_limit(need)),
    )(h, m3, inv_len, w1, b1, w2, b2)
    return out[:B] if Bp != B else out


# ---------------------------------------------------------------------------
# Demo / self-check
# ---------------------------------------------------------------------------

if __name__ == "__main__":
    # Small shapes consistent with the module: batch=2, seq=8, input_dim=32,
    # hidden_dim=32, output_dim=32.
    B, S, D, H, O = 2, 8, 32, 32, 32

    key = jax.random.PRNGKey(0)
    k_h, k_w1, k_b1, k_w2, k_b2 = jax.random.split(key, 5)

    last_hidden = jax.random.normal(k_h, (B, S, D), dtype=jnp.float32)
    # Deterministic mask: first batch has 6 valid tokens, second has 8.
    lengths = jnp.array([6, 8], dtype=jnp.int32)
    mask = (jnp.arange(S)[None, :] < lengths[:, None]).astype(jnp.float32)

    # Deterministic parameter init (synthetic; no checkpoint loading).
    w1 = jax.random.normal(k_w1, (D, H), dtype=jnp.float32) * 0.05
    b1 = jax.random.normal(k_b1, (1, H), dtype=jnp.float32) * 0.01
    w2 = jax.random.normal(k_w2, (H, O), dtype=jnp.float32) * 0.05
    b2 = jax.random.normal(k_b2, (1, O), dtype=jnp.float32) * 0.01

    # Mean-pooled path (module default).
    z = projector_forward(last_hidden, mask, w1, b1, w2, b2, do_avg=True)
    jax.block_until_ready(z)

    # Pure-JAX reference (elementwise pooling, like PyTorch).  Tolerance allows
    # for the MXU's default f32 precision on the in-kernel pooling contraction.
    pooled_ref = (last_hidden * mask[:, :, None]).sum(1) / mask.sum(1, keepdims=True)
    z_ref = jnp.maximum(pooled_ref @ w1 + b1, 0.0) @ w2 + b2
    assert z.shape == (B, O)
    assert jnp.allclose(z, z_ref, atol=2e-3, rtol=2e-3), \
        float(jnp.max(jnp.abs(z - z_ref)))

    # CLS-token path (do_avg=False).
    z_cls = projector_forward(last_hidden, mask, w1, b1, w2, b2, do_avg=False)
    jax.block_until_ready(z_cls)
    z_cls_ref = jnp.maximum(last_hidden[:, 0] @ w1 + b1, 0.0) @ w2 + b2
    assert jnp.allclose(z_cls, z_cls_ref, atol=2e-3, rtol=2e-3), \
        float(jnp.max(jnp.abs(z_cls - z_cls_ref)))

    print("KERNEL_OK")
</pallas_src>

<mosaic_0001>
module attributes {stable_mosaic.version = 11 : i64} {
  func.func @_projector_avg_kernel(%arg0: i32, %arg1: i32, %arg2: memref<2x8x32xf32, #tpu.memory_space<vmem>>, %arg3: memref<2x1x8xf32, #tpu.memory_space<vmem>>, %arg4: memref<2x1xf32, #tpu.memory_space<vmem>>, %arg5: memref<32x32xf32, #tpu.memory_space<vmem>>, %arg6: memref<1x32xf32, #tpu.memory_space<vmem>>, %arg7: memref<32x32xf32, #tpu.memory_space<vmem>>, %arg8: memref<1x32xf32, #tpu.memory_space<vmem>>, %arg9: memref<2x32xf32, #tpu.memory_space<vmem>>, %arg10: memref<2x1x32xf32, #tpu.memory_space<vmem>>) attributes {dimension_semantics = [#tpu.dimension_semantics<parallel>, #tpu.dimension_semantics<arbitrary>], iteration_bounds = array<i64: 1, 1>, scalar_prefetch = 0 : i64, scratch_operands = 1 : i64, tpu.core_type = #tpu.core_type<tc>, window_params = [{transform_indices = @transform_0, window_bounds = array<i64: 2, 8, 32>}, {transform_indices = @transform_1, window_bounds = array<i64: 2, 1, 8>}, {transform_indices = @transform_2, window_bounds = array<i64: 2, 1>}, {pipeline_mode = #tpu.pipeline_mode<synchronous>, transform_indices = @transform_3, window_bounds = array<i64: 32, 32>}, {pipeline_mode = #tpu.pipeline_mode<synchronous>, transform_indices = @transform_4, window_bounds = array<i64: 1, 32>}, {pipeline_mode = #tpu.pipeline_mode<synchronous>, transform_indices = @transform_5, window_bounds = array<i64: 32, 32>}, {pipeline_mode = #tpu.pipeline_mode<synchronous>, transform_indices = @transform_6, window_bounds = array<i64: 1, 32>}, {transform_indices = @transform_7, window_bounds = array<i64: 2, 32>}]} {
    %c0_i32 = arith.constant 0 : i32
    %0 = arith.cmpi eq, %arg1, %c0_i32 : i32
    %1 = arith.extui %0 : i1 to i32
    %c0_i32_0 = arith.constant 0 : i32
    %2 = arith.cmpi ne, %1, %c0_i32_0 : i32
    scf.if %2 {
      %cst_14 = arith.constant 0.000000e+00 : f32
      %12 = vector.broadcast %cst_14 : f32 to vector<2x1x32xf32>
      %c0_15 = arith.constant 0 : index
      %c0_16 = arith.constant 0 : index
      %c0_17 = arith.constant 0 : index
      %13 = vector.load %arg10[%c0_15, %c0_16, %c0_17] : memref<2x1x32xf32, #tpu.memory_space<vmem>>, vector<2x1x32xf32>
      tpu.vector_store %arg10[%c0_15, %c0_16, %c0_17], %12 {strides = array<i32>} : memref<2x1x32xf32, #tpu.memory_space<vmem>>, vector<2x1x32xf32>,
    } else {
    }
    %c0 = arith.constant 0 : index
    %c0_1 = arith.constant 0 : index
    %c0_2 = arith.constant 0 : index
    %3 = vector.load %arg10[%c0, %c0_1, %c0_2] : memref<2x1x32xf32, #tpu.memory_space<vmem>>, vector<2x1x32xf32>
    %c0_3 = arith.constant 0 : index
    %c0_4 = arith.constant 0 : index
    %c0_5 = arith.constant 0 : index
    %4 = vector.load %arg3[%c0_3, %c0_4, %c0_5] : memref<2x1x8xf32, #tpu.memory_space<vmem>>, vector<2x1x8xf32>
    %c0_6 = arith.constant 0 : index
    %c0_7 = arith.constant 0 : index
    %c0_8 = arith.constant 0 : index
    %5 = vector.load %arg2[%c0_6, %c0_7, %c0_8] : memref<2x8x32xf32, #tpu.memory_space<vmem>>, vector<2x8x32xf32>
    "tpu.trace_start"() <{level = 10 : i32, message = "bqs,bsd->bqd"}> : () -> ()
    %cst = arith.constant dense<0.000000e+00> : vector<2x1x32xf32>
    %6 = tpu.matmul %4, %5, %cst {dimension_numbers = #tpu.dot_dimension_numbers<[2], [1], [1], [2], [0, 0, 0, 1, 1, 2], [0], [0]>} : vector<2x1x8xf32>, vector<2x8x32xf32>, vector<2x1x32xf32> -> vector<2x1x32xf32>
    "tpu.trace_stop"() : () -> ()
    %7 = arith.addf %3, %6 : vector<2x1x32xf32>
    %c0_9 = arith.constant 0 : index
    %c0_10 = arith.constant 0 : index
    %c0_11 = arith.constant 0 : index
    %8 = vector.load %arg10[%c0_9, %c0_10, %c0_11] : memref<2x1x32xf32, #tpu.memory_space<vmem>>, vector<2x1x32xf32>
    tpu.vector_store %arg10[%c0_9, %c0_10, %c0_11], %7 {strides = array<i32>} : memref<2x1x32xf32, #tpu.memory_space<vmem>>, vector<2x1x32xf32>,
    %c0_i32_12 = arith.constant 0 : i32
    %9 = arith.cmpi eq, %arg1, %c0_i32_12 : i32
    %10 = arith.extui %9 : i1 to i32
    %c0_i32_13 = arith.constant 0 : i32
    %11 = arith.cmpi ne, %10, %c0_i32_13 : i32
    scf.if %11 {
      %c0_14 = arith.constant 0 : index
      %c0_15 = arith.constant 0 : index
      %c0_16 = arith.constant 0 : index
      %12 = vector.load %arg10[%c0_14, %c0_15, %c0_16] : memref<2x1x32xf32, #tpu.memory_space<vmem>>, vector<2x1x32xf32>
      %13 = vector.shape_cast %12 : vector<2x1x32xf32> to vector<2x32xf32>
      %c0_17 = arith.constant 0 : index
      %c0_18 = arith.constant 0 : index
      %14 = vector.load %arg4[%c0_17, %c0_18] : memref<2x1xf32, #tpu.memory_space<vmem>>, vector<2x1xf32>
      %15 = vector.broadcast %14 : vector<2x1xf32> to vector<2x32xf32>
      %16 = arith.mulf %13, %15 : vector<2x32xf32>
      %c0_19 = arith.constant 0 : index
      %c0_20 = arith.constant 0 : index
      %17 = vector.load %arg5[%c0_19, %c0_20] : memref<32x32xf32, #tpu.memory_space<vmem>>, vector<32x32xf32>
      %cst_21 = arith.constant dense<0.000000e+00> : vector<2x32xf32>
      %18 = tpu.matmul %16, %17, %cst_21 {dimension_numbers = #tpu.dot_dimension_numbers<[1], [0], [0], [1], [0, 0, 1, 1], [], []>} : vector<2x32xf32>, vector<32x32xf32>, vector<2x32xf32> -> vector<2x32xf32>
      %c0_22 = arith.constant 0 : index
      %c0_23 = arith.constant 0 : index
      %19 = vector.load %arg6[%c0_22, %c0_23] : memref<1x32xf32, #tpu.memory_space<vmem>>, vector<1x32xf32>
      %20 = vector.broadcast %19 : vector<1x32xf32> to vector<2x32xf32>
      %21 = arith.addf %18, %20 : vector<2x32xf32>
      %cst_24 = arith.constant 0.000000e+00 : f32
      %22 = vector.broadcast %cst_24 : f32 to vector<2x32xf32>
      %23 = arith.maximumf %21, %22 : vector<2x32xf32>
      %c0_25 = arith.constant 0 : index
      %c0_26 = arith.constant 0 : index
      %24 = vector.load %arg7[%c0_25, %c0_26] : memref<32x32xf32, #tpu.memory_space<vmem>>, vector<32x32xf32>
      %cst_27 = arith.constant dense<0.000000e+00> : vector<2x32xf32>
      %25 = tpu.matmul %23, %24, %cst_27 {dimension_numbers = #tpu.dot_dimension_numbers<[1], [0], [0], [1], [0, 0, 1, 1], [], []>} : vector<2x32xf32>, vector<32x32xf32>, vector<2x32xf32> -> vector<2x32xf32>
      %c0_28 = arith.constant 0 : index
      %c0_29 = arith.constant 0 : index
      %26 = vector.load %arg8[%c0_28, %c0_29] : memref<1x32xf32, #tpu.memory_space<vmem>>, vector<1x32xf32>
      %27 = vector.broadcast %26 : vector<1x32xf32> to vector<2x32xf32>
      %28 = arith.addf %25, %27 : vector<2x32xf32>
      %c0_30 = arith.constant 0 : index
      %c0_31 = arith.constant 0 : index
      %29 = vector.load %arg9[%c0_30, %c0_31] : memref<2x32xf32, #tpu.memory_space<vmem>>, vector<2x32xf32>
      tpu.vector_store %arg9[%c0_30, %c0_31], %28 {strides = array<i32>} : memref<2x32xf32, #tpu.memory_space<vmem>>, vector<2x32xf32>,
    } else {
    }
    return
  }
  func.func @transform_0(%arg0: i32, %arg1: i32) -> (i32, i32, i32) {
    %c0_i32 = arith.constant 0 : i32
    %c0_i32_0 = arith.constant 0 : i32
    return %arg0, %arg1, %c0_i32 : i32, i32, i32
  }
  func.func @transform_1(%arg0: i32, %arg1: i32) -> (i32, i32, i32) {
    %c0_i32 = arith.constant 0 : i32
    %c0_i32_0 = arith.constant 0 : i32
    return %arg0, %c0_i32, %arg1 : i32, i32, i32
  }
  func.func @transform_2(%arg0: i32, %arg1: i32) -> (i32, i32) {
    %c0_i32 = arith.constant 0 : i32
    %c0_i32_0 = arith.constant 0 : i32
    return %arg0, %c0_i32 : i32, i32
  }
  func.func @transform_3(%arg0: i32, %arg1: i32) -> (i32, i32) {
    %c0_i32 = arith.constant 0 : i32
    %c0_i32_0 = arith.constant 0 : i32
    %c0_i32_1 = arith.constant 0 : i32
    return %c0_i32, %c0_i32_0 : i32, i32
  }
  func.func @transform_4(%arg0: i32, %arg1: i32) -> (i32, i32) {
    %c0_i32 = arith.constant 0 : i32
    %c0_i32_0 = arith.constant 0 : i32
    %c0_i32_1 = arith.constant 0 : i32
    return %c0_i32, %c0_i32_0 : i32, i32
  }
  func.func @transform_5(%arg0: i32, %arg1: i32) -> (i32, i32) {
    %c0_i32 = arith.constant 0 : i32
    %c0_i32_0 = arith.constant 0 : i32
    %c0_i32_1 = arith.constant 0 : i32
    return %c0_i32, %c0_i32_0 : i32, i32
  }
  func.func @transform_6(%arg0: i32, %arg1: i32) -> (i32, i32) {
    %c0_i32 = arith.constant 0 : i32
    %c0_i32_0 = arith.constant 0 : i32
    %c0_i32_1 = arith.constant 0 : i32
    return %c0_i32, %c0_i32_0 : i32, i32
  }
  func.func @transform_7(%arg0: i32, %arg1: i32) -> (i32, i32) {
    %c0_i32 = arith.constant 0 : i32
    %c0_i32_0 = arith.constant 0 : i32
    return %arg0, %c0_i32 : i32, i32
  }
}

</mosaic_0001>

<bundles_post_ra>
// kernel: tpu_custom_call.1
= control target key start
LH: loop header
LB: loop body
LE: loop exit
PB: predicated region body
PF: predicated region fallthrough
CT: control target
= control target key end

     0   :  { %12 = vsyncpa [#allocation4], 0  ;;  %s767_s0 = inlined_call_operand.hbm [shape: f32[2,8,32], index: 0, kind: input, shape index: {}]   ;;  %s768_s1 = inlined_call_operand.vmem [shape: f32[2,1,8], index: 1, kind: input, shape index: {}]   ;;  %s769_s2 = inlined_call_operand.vmem [shape: f32[2,1], index: 2, kind: input, shape index: {}]   ;;  %s770_s3 = inlined_call_operand.hbm [shape: f32[32,32], index: 3, kind: input, shape index: {}]   ;;  %s771_s4 = inlined_call_operand.vmem [shape: f32[1,32], index: 4, kind: input, shape index: {}]   ;;  %s772_s5 = inlined_call_operand.hbm [shape: f32[32,32], index: 5, kind: input, shape index: {}]   ;;  %s773_s6 = inlined_call_operand.vmem [shape: f32[1,32], index: 6, kind: input, shape index: {}]   ;;  %s774_s7 = inlined_call_operand.hbm [shape: f32[2,32], index: 7, kind: output, shape index: {}]  }
   0x1   :  { %13 = vsyncpa [#allocation7], 0 }
   0x2   :  { %14 = vsyncpa [#allocation5], 0  ;;  %s629_s24 = smov [#allocation6]   ;;  %s630_s26 = smov [#allocation3]  }
   0x3   :  { %s36_s25 = sshll.u32 %s629_s24, 4  ;;  %s20_s27 = sshll.u32 %s630_s26, 4  ;;  %s37_s25 = int_to_ptr.vmem [resolvable:$true] %s36_s25  ;;  %s680_s27 = int_to_ptr.vmem [resolvable:$true] %s20_s27 }
   0x4   :  { %s535_s30 = scalar_lea.hbm %s770_s3, 512 }
   0x5   :  { %p536_p0 = scmp.ne.s32.totalorder %s770_s3, %s535_s30  ;;  %p539_p1 = scmp.lt.u32.totalorder %s535_s30, %s770_s3 }
   0x7   :  { %p541_p2 = pnand %p539_p1, %p536_p0 }
   0x9   :  { %544 = shalt.err (!%p541_p2)
}
   0xa   :  { %s545_s12 = scalar_lea.vmem %s37_s25, 512  ;;  %p550_p4 = scmp.lt.s32.totalorder %s37_s25, %s37_s25 }
   0xb   :  { %p546_p3 = scmp.ne.s32.totalorder %s37_s25, %s545_s12  ;;  %p551_p5 = scmp.lt.s32.totalorder %s545_s12, %s545_s12 }
   0xd   :  { %p552_p6 = por %p551_p5, %p550_p4 }
   0xf   :  { %p553_p7 = pnand %p552_p6, %p546_p3 }
  0x11   :  { %556 = shalt.err (!%p553_p7)
}
  0x12   :  { %s631_s13 = smov 128   ;;  %s632_s14 = smov 8  }
  0x13   :  { %42 = dma.hbm_to_vmem [thread:$0]  %s770_s3, 512, %s37_s25, [#allocation7], %s631_s13, %s631_s13, %s632_s14  }
  0x14   :  { %s557_s19 = scalar_lea.hbm %s767_s0, 256 }
  0x15   :  { %p558_p8 = scmp.ne.s32.totalorder %s767_s0, %s557_s19  ;;  %p561_p9 = scmp.lt.u32.totalorder %s557_s19, %s767_s0 }
  0x17   :  { %p563_p10 = pnand %p561_p9, %p558_p8 }
  0x19   :  { %566 = shalt.err (!%p563_p10)
}
  0x1a   :  { %s567_s24 = scalar_lea.vmem %s680_s27, 256  ;;  %p572_p12 = scmp.lt.s32.totalorder %s680_s27, %s680_s27 }
  0x1b   :  { %p568_p11 = scmp.ne.s32.totalorder %s680_s27, %s567_s24  ;;  %p573_p13 = scmp.lt.s32.totalorder %s567_s24, %s567_s24 }
  0x1d   :  { %p574_p0 = por %p573_p13, %p572_p12 }
  0x1f   :  { %p575_p1 = pnand %p574_p0, %p568_p11 }
  0x21   :  { %578 = shalt.err (!%p575_p1)
}
  0x22   :  { %26 = dma.hbm_to_vmem [thread:$0]  %s767_s0, 256, %s680_s27, [#allocation4], %s631_s13, %s631_s13, %s632_s14  }
  0x23   :  { %s633_s26 = smov [#allocation8]   ;;  %s579_s8 = scalar_lea.hbm %s772_s5, 512 }
  0x24   :  { %s50_s28 = sshll.u32 %s633_s26, 4  ;;  %p580_p2 = scmp.ne.s32.totalorder %s772_s5, %s579_s8  ;;  %s51_s28 = int_to_ptr.vmem [resolvable:$true] %s50_s28 }
  0x25   :  { %p583_p3 = scmp.lt.u32.totalorder %s579_s8, %s772_s5 }
  0x27   :  { %p585_p4 = pnand %p583_p3, %p580_p2 }
  0x29   :  { %588 = shalt.err (!%p585_p4)
}
  0x2a   :  { %s589_s15 = scalar_lea.vmem %s51_s28, 512  ;;  %p594_p6 = scmp.lt.s32.totalorder %s51_s28, %s51_s28 }
  0x2b   :  { %p590_p5 = scmp.ne.s32.totalorder %s51_s28, %s589_s15  ;;  %p595_p7 = scmp.lt.s32.totalorder %s589_s15, %s589_s15 }
  0x2d   :  { %p596_p8 = por %p595_p7, %p594_p6 }
  0x2f   :  { %p597_p9 = pnand %p596_p8, %p590_p5 }
  0x31   :  { %600 = shalt.err (!%p597_p9)
}
  0x32   :  { %56 = dma.hbm_to_vmem [thread:$0]  %s772_s5, 512, %s51_s28, [#allocation7], %s631_s13, %s631_s13, %s632_s14  }
  0x33   :  { %623 = dma.done.wait [#allocation4], 256  }
  0x34   :  { %624 = vsyncadd [#allocation4], 4294967040 }
  0x35   :  { %625 = dma.done.wait [#allocation7], 1024  }
  0x36   :  { %626 = vsyncadd [#allocation7], 4294966272  ;;  %v634_v0 = vmov 0.0   ;;  %vm72_vm0 = vcmask 253952   ;;  %vm635_vm1 = vmmov 0   ;;  %v636_v1 = vmov 0  }
  0x37   :  { %479 = vmatprep.subr.mxu0 %v634_v0  ;;  %484 = vmatprep.subr.mxu1 %v634_v0  ;;  %73 = vst.msk [vmem:[#allocation2] sm:$0x1] %vm72_vm0, %v634_v0  ;;  %74 = vst.msk [vmem:[#allocation2 + $0x1] sm:$0x1] %vm72_vm0, %v634_v0  ;;  %vm81_vm2 = vcmask 64512   ;;  %v79_v2 = vld [vmem:[#allocation3] sm:$0xff]  ;;  %v243_v17 = vlaneseq }
  0x38   :  { %481 = vmatprep.mubr.msk.f32.mxu0 %vm635_vm1, %v634_v0  ;;  %486 = vmatprep.mubr.msk.f32.mxu1 %vm635_vm1, %v634_v0  ;;  %v80_v3 = vld [vmem:[#allocation3 + $0x8] sm:$0xff]  ;;  %v77_v4 = vld [vmem:[%s768_s1] sm:$0x1]  ;;  %v78_v5 = vld [vmem:[%s768_s1 + $0x1] sm:$0x1]  ;;  %v637_v10 = vmov 0.0|0.0  }
  0x39   :  { %534 = vset.pattern.permute.xlu0 %v636_v1  ;;  %480 = vmatpush3.msra.mxu0 %v79_v2  ;;  %v238_v6 = vld [vmem:[%s769_s2] sm:$0x3]  ;;  %v255_v7 = vld [vmem:[#allocation6] sm:$0xff]  ;;  %v257_v11 = vld [vmem:[#allocation6 + $0x10] sm:$0xff]  ;;  %v244_v20 = vshrl.u32 %v243_v17, 7  ;;  %vm283_vm3 = vcmask 261120  }
  0x3a   :  { %485 = vmatpush3.msra.mxu1 %v80_v3  ;;  %482 = vmatmul.mubr.msk.f32.vlgmr.msra.gmra.mrb[0].mxu0 %vm81_vm2, %v77_v4  ;;  %v256_v8 = vld [vmem:[#allocation6 + $0x8] sm:$0xff]  ;;  %v258_v12 = vld [vmem:[#allocation6 + $0x18] sm:$0xff]  ;;  %v357_v14 = vld [vmem:[#allocation8] sm:$0xff]  ;;  %v638_v29 = vmov 1966171168   ;;  %s639_s21 = smov [#allocation9]  }
  0x3b   :  { %487 = vmatmul.mubr.msk.f32.vlgmr.msra.gmra.mrb[0].mxu1 %vm81_vm2, %v78_v5  ;;  %241 = vperm.xlu0 %534, %v238_v6   ;;  %v512_v9 = vpack.c.bf16 %v256_v8, %v255_v7  ;;  %v515_v13 = vpack.c.bf16 %v258_v12, %v257_v11  ;;  %v358_v15 = vld [vmem:[#allocation8 + $0x8] sm:$0xff]  ;;  %v245_v27 = vsub.s32 0, %v244_v20  ;;  %v249_v28 = vsub.s32 1, %v244_v20  ;;  %v359_v43 = vld [vmem:[#allocation8 + $0x10] sm:$0xff]  ;;  %v360_v44 = vld [vmem:[#allocation8 + $0x18] sm:$0xff]  ;;  %s449_s22 = sshll.u32 %s639_s21, 4  ;;  %s450_s22 = int_to_ptr.vmem [resolvable:$true] %s449_s22 }
  0x3c   :  { %497 = vmatprep.mubr.msk.f32.mxu0 %vm635_vm1, %v634_v0  ;;  %508 = vmatprep.mubr.msk.f32.mxu1 %vm635_vm1, %v634_v0  ;;  %v518_v16 = vpack.c.bf16 %v358_v15, %v357_v14  ;;  %v270_v30 = vunpack.c.l.s4 %v638_v29  ;;  %v521_v45 = vpack.c.bf16 %v360_v44, %v359_v43  ;;  %v461_v46 = vld [vmem:[%s771_s4] ss:$0 sm:$0xff]  ;;  %vm441_vm4 = vcmask 254976   ;;  %s601_s23 = scalar_lea.vmem %s450_s22, 32  ;;  %p606_p11 = scmp.lt.s32.totalorder %s450_s22, %s450_s22 }
  0x3d   :  { %511 = vmatprep.subr.bf16.mxu0 %v637_v10  ;;  %517 = vmatprep.subr.bf16.mxu1 %v637_v10  ;;  %v463_v51 = vld [vmem:[%s773_s6] ss:$0 sm:$0xff]  ;;  %p602_p10 = scmp.ne.s32.totalorder %s450_s22, %s601_s23  ;;  %p607_p12 = scmp.lt.s32.totalorder %s601_s23, %s601_s23 }
  0x3e   :  { %513 = vmatpush3.bf16.msra.mxu0 %v512_v9  ;;  %519 = vmatpush3.bf16.msra.mxu1 %v518_v16  ;;  %v75_v18 = vld [vmem:[#allocation2] sm:$0x1]  ;;  %v76_v19 = vld [vmem:[#allocation2 + $0x1] sm:$0x1]  ;;  %v271_v32 = vunpack.c.0.s8 %v270_v30 }
  0x3f   :  { %514 = vmatprep.subr.bf16.mxu0 %v637_v10  ;;  %520 = vmatprep.subr.bf16.mxu1 %v637_v10  ;;  %p608_p13 = por %p607_p12, %p606_p11 }
  0x40   :  { %v274_v37 = vsub.s32 %v271_v32, %v244_v20 }
  0x41   :  { %p609_p0 = pnand %p608_p13, %p602_p10 }
  0x42   :  { %516 = vmatpush3.bf16.msra.mxu0 %v515_v13  ;;  %522 = vmatpush3.bf16.msra.mxu1 %v521_v45 }
  0xba   :  { %v242_v31 = vpop.permute.xlu0 %241 }
  0xbb   :  { %v246_v33 = vrot.slane %v242_v31, %v245_v27  ;;  %v250_v34 = vrot.slane %v242_v31, %v249_v28 }
 0x10d   :  { %v151_v21 = vpop.f32.mrb[0].mxu0 }
 0x10e   :  { %v224_v22 = vpop.f32.mrb[0].mxu1  ;;  %v228_v23 = vadd.f32 %v151_v21, %v75_v18  ;;  %v483_v25 = vpop.f32.mrb[1].mxu0 }
 0x10f   :  { %v229_v24 = vadd.f32 %v224_v22, %v76_v19  ;;  %v488_v26 = vpop.f32.mrb[1].mxu1 }
 0x110   :  { %231 = vst.msk [vmem:[#allocation2] sm:$0x1] %vm72_vm0, %v228_v23 }
 0x111   :  { %232 = vst.msk [vmem:[#allocation2 + $0x1] sm:$0x1] %vm72_vm0, %v229_v24 }
 0x117   :  { %v236_v35 = vld [vmem:[#allocation2] sm:$0x1] }
 0x118   :  { %v237_v36 = vld [vmem:[#allocation2 + $0x1] sm:$0x1]  ;;  %v253_v38 = vmul.f32 %v246_v33, %v236_v35 }
 0x119   :  { %v254_v39 = vmul.f32 %v250_v34, %v237_v36 }
 0x11b   :  { %v268_v40 = vcombine.low %v253_v38, %v254_v39 }
 0x11d   :  { %v275_v41 = vrot.slane %v268_v40, %v274_v37 }
 0x11f   :  { %v282_v42 = vrot.slane %v275_v41, %v274_v37 }
 0x121   :  { %498 = vmatmul.mubr.msk.f32.vlgmr.msra.gmra.mrb[2].mxu0 %vm283_vm3, %v282_v42 }
 0x1f4   :  { %v352_v47 = vpop.f32.mrb[2].mxu0 }
 0x1f5   :  { %v353_v48 = vadd.f32 %v461_v46, %v352_v47  ;;  %v499_v49 = vpop.f32.mrb[3].mxu0 }
 0x1f7   :  { %v356_v50 = vmax.f32 %v353_v48, 0.0 }
 0x1f9   :  { %509 = vmatmul.mubr.msk.f32.vlgmr.msra.gmra.mrb[2].mxu1 %vm283_vm3, %v356_v50 }
 0x2cc   :  { %v437_v52 = vpop.f32.mrb[2].mxu1 }
 0x2cd   :  { %v438_v53 = vadd.f32 %v463_v51, %v437_v52  ;;  %v510_v54 = vpop.f32.mrb[3].mxu1 }
 0x2cf   :  { %442 = vst.msk [vmem:[#allocation9] sm:$0x3] %vm441_vm4, %v438_v53 }
 0x2d0   :  { %612 = shalt.err (!%p609_p0)
}
 0x2d1   :  { %s613_s3 = scalar_lea.hbm %s774_s7, 32 }
 0x2d2   :  { %p614_p1 = scmp.ne.s32.totalorder %s774_s7, %s613_s3  ;;  %p617_p2 = scmp.lt.u32.totalorder %s613_s3, %s774_s7 }
 0x2d4   :  { %p619_p3 = pnand %p617_p2, %p614_p1 }
 0x2d6   :  { %622 = shalt.err (!%p619_p3)
}
 0x2d7   :  { %452 = dma.vmem_to_hbm [thread:$0]  %s450_s22, 32, %s774_s7, [#allocation5]  }
 0x2d8   :  { %627 = dma.done.wait [#allocation5], 32  }
 0x2d9   :  { %628 = vsyncadd [#allocation5], 4294967264 }
 0x2da   :  { %456 = vsyncpa [#allocation4], 1 }
 0x2db   :  { %457 = vsyncpa [#allocation7], 1 }
 0x2dc   :  { %458 = vsyncpa [#allocation5], 1 }

</bundles_post_ra>
